<compile_context>
chip_gen: v7x
topology: tpu7x:2x2x1
jax: 0.10.0
libtpu: 0.0.40
codegen_flags: <defaults>
</compile_context>

<pallas_src>
import functools

import numpy as np
import jax
import jax.numpy as jnp
from jax import lax
from jax.experimental import pallas as pl
from jax.experimental.pallas import tpu as pltpu

KERNEL_SIZE = 11
SIGMA = 1.5
K1, K2 = 0.01, 0.03
DATA_RANGE = 1.0


def _round_up(x, m):
    return -(-x // m) * m


def _gaussian_1d(kernel_size=KERNEL_SIZE, sigma=SIGMA):
    # matches torchmetrics._gaussian
    dist = np.arange((1 - kernel_size) / 2.0, (1 + kernel_size) / 2.0, 1.0,
                     dtype=np.float64)
    g = np.exp(-((dist / sigma) ** 2) / 2.0)
    return (g / g.sum()).astype(np.float32)


def _band_matrix(n_out, n_in, g):
    # K[i, i:i+len(g)] = g  ->  (K @ img) is a valid 1-D Gaussian conv along rows
    k = len(g)
    m = np.zeros((n_out, n_in), dtype=np.float32)
    for i in range(n_out):
        m[i, i:i + k] = g
    return m


def _vmem_limits():
    # Generation-aware budgeting: ~128 MiB physical VMEM on v5e/v6e, 64 MiB on v7x.
    try:
        phys = int(getattr(pltpu.get_tpu_info(), "vmem_capacity_bytes", 0))
    except Exception:
        phys = 0
    if phys <= 0:
        phys = 64 << 20                      # conservative fallback (v7x-sized)
    limit = min(phys // 2, 64 << 20)         # scoped limit requested from Mosaic
    budget = (limit * 3) // 4                # planning budget (headroom for compiler)
    return limit, budget


def _choose_pack(num_images, w):
    # Pack g images side-by-side along lanes so a pack spans <= 128 lanes (one vreg /
    # one MXU contraction pass).  Keep >= 2 packs when possible so the parallel grid
    # axis can still shard across v7x's two TensorCores.
    g = 1
    for d in range(1, num_images + 1):
        if (num_images % d == 0 and d * w <= 128
                and (num_images // d >= 2 or num_images == 1)):
            g = d
    return g


def _choose_block(num_packed, per_pack_bytes, fixed_bytes, budget_bytes):
    # Largest divisor of num_packed under the VMEM budget, keeping >= 2 grid blocks
    # whenever there are >= 2 packs (v7x megacore / pipeline overlap).
    cap = max(1, (budget_bytes - fixed_bytes) // max(per_pack_bytes, 1))
    b = 1
    for d in range(1, num_packed + 1):
        if (num_packed % d == 0 and d <= cap
                and (num_packed // d >= 2 or num_packed == 1)):
            b = d
    return b


def _ssim_kernel(x_ref, y_ref, kh_ref, kwt_ref, out_ref, acc_ref, *,
                 b, fused, hp, hop, ho, wo_valid, wop, c1, c2, unroll):
    kh = kh_ref[...]            # fused: (5*hop, 5*hp) block-diag; else (hop, hp)
    kwt = kwt_ref[...]          # (g*W, wop) lane-block-diagonal column filter

    acc_ref[...] = jnp.zeros_like(acc_ref)     # per-block plane accumulator

    def per_pack(i, carry):
        x = x_ref[i].astype(jnp.float32)       # (hp, g*W)
        y = y_ref[i].astype(jnp.float32)
        # five stat planes stacked along sublanes -> one shared W-contraction matmul
        stats = jnp.concatenate([x, y, x * x, y * y, x * y], axis=0)   # (5*hp, g*W)
        t = jnp.dot(stats, kwt, preferred_element_type=jnp.float32)    # (5*hp, wop)
        if fused:
            # small H: one block-diagonal H-contraction matmul for all five planes
            f = jnp.dot(kh, t, preferred_element_type=jnp.float32)     # (5*hop, wop)
            mu_x = f[0 * hop:1 * hop]
            mu_y = f[1 * hop:2 * hop]
            e_xx = f[2 * hop:3 * hop]
            e_yy = f[3 * hop:4 * hop]
            e_xy = f[4 * hop:5 * hop]
        else:
            # large H: apply the minimal (hop, hp) kh per plane -> no wasted FLOPs/VMEM
            mu_x = jnp.dot(kh, t[0 * hp:1 * hp], preferred_element_type=jnp.float32)
            mu_y = jnp.dot(kh, t[1 * hp:2 * hp], preferred_element_type=jnp.float32)
            e_xx = jnp.dot(kh, t[2 * hp:3 * hp], preferred_element_type=jnp.float32)
            e_yy = jnp.dot(kh, t[3 * hp:4 * hp], preferred_element_type=jnp.float32)
            e_xy = jnp.dot(kh, t[4 * hp:5 * hp], preferred_element_type=jnp.float32)

        mu_x2 = mu_x * mu_x
        mu_y2 = mu_y * mu_y
        mu_xy = mu_x * mu_y
        num = (2.0 * mu_xy + c1) * (2.0 * (e_xy - mu_xy) + c2)
        den = (mu_x2 + mu_y2 + c1) * (e_xx - mu_x2 + e_yy - mu_y2 + c2)
        r = pl.reciprocal(den, approx=True)
        r = r * (2.0 - den * r)                 # one Newton-Raphson refinement
        acc_ref[...] += num * r                 # VALU add; cross-lane reduce deferred
        return carry

    lax.fori_loop(0, b, per_pack, 0, unroll=unroll)

    # mask out pad rows/cols once per block, then a single cross-lane reduction
    row = lax.broadcasted_iota(jnp.int32, (hop, wop), 0)
    col = lax.broadcasted_iota(jnp.int32, (hop, wop), 1)
    valid = (row < ho) & (col < wo_valid)
    total = jnp.sum(jnp.where(valid, acc_ref[...], 0.0))
    # lane-dense, (8,128)-aligned store of the per-block partial sum
    out_ref[...] = jnp.broadcast_to(jnp.reshape(total, (1, 1, 1)), (1, 8, 128))


def ssim_loss(preds, targets):
    n, c, h, w = preds.shape
    assert targets.shape == preds.shape
    assert h >= KERNEL_SIZE and w >= KERNEL_SIZE
    ho, wo = h - KERNEL_SIZE + 1, w - KERNEL_SIZE + 1
    hp, hop = _round_up(h, 8), _round_up(ho, 8)

    num_images = n * c
    in_dtype = preds.dtype
    if in_dtype not in (jnp.float32, jnp.bfloat16, jnp.float16):
        in_dtype = jnp.float32
    x = preds.reshape(num_images, h, w).astype(in_dtype)
    y = targets.reshape(num_images, h, w).astype(in_dtype)

    # pad H to a sublane multiple so in-kernel plane stacking/slicing stays aligned
    if hp != h:
        x = jnp.pad(x, ((0, 0), (0, hp - h), (0, 0)))
        y = jnp.pad(y, ((0, 0), (0, hp - h), (0, 0)))

    # lane-pack small images (g consecutive images side-by-side along W)
    gpack = _choose_pack(num_images, w)
    num_packed = num_images // gpack
    gw = gpack * w
    if gpack > 1:
        x = x.reshape(num_packed, gpack, hp, w).transpose(0, 2, 1, 3) \
             .reshape(num_packed, hp, gw)
        y = y.reshape(num_packed, gpack, hp, w).transpose(0, 2, 1, 3) \
             .reshape(num_packed, hp, gw)
    else:
        x = x.reshape(num_packed, hp, gw)
        y = y.reshape(num_packed, hp, gw)

    wo_valid = gpack * wo
    wop = _round_up(wo_valid, 128)

    g1d = _gaussian_1d()
    kh_band = _band_matrix(ho, h, g1d)              # (ho, H)
    kw_t = _band_matrix(wo, w, g1d).T               # (W, wo)

    # column (W) filter: lane-block-diagonal across packed images; outputs land
    # densely in lanes [0, gpack*wo)
    kwt = np.zeros((gw, wop), np.float32)
    for j in range(gpack):
        kwt[j * w:(j + 1) * w, j * wo:(j + 1) * wo] = kw_t

    # row (H) filter: fused block-diagonal only while the 5*Hp contraction fits a
    # single MXU pass (<=256 on v6e/v7x; bounded <2x waste on v5e in 128..256);
    # otherwise a single minimal (hop, hp) kh applied per plane.
    fused = (5 * hp) <= 256
    kh_pad = np.zeros((hop, hp), np.float32)
    kh_pad[:ho, :h] = kh_band
    if fused:
        kh = np.zeros((5 * hop, 5 * hp), np.float32)
        for k in range(5):
            kh[k * hop:(k + 1) * hop, k * hp:(k + 1) * hp] = kh_pad
    else:
        kh = kh_pad

    # VMEM accounting (counts the double-buffered constants, plane accumulator, output)
    vmem_limit, vmem_budget = _vmem_limits()
    in_bytes = np.dtype(in_dtype).itemsize
    per_pack_bytes = (2 * 2 * hp * gw * in_bytes                    # x,y double-buffered
                      + (5 * hp * gw                                # stat stack
                         + 5 * hp * wop                             # W-filtered intermediate
                         + 5 * hop * wop                            # filtered maps
                         + 4 * hop * wop) * 4)                      # ssim temporaries
    fixed_bytes = (2 * (kh.size + kwt.size) * 4                     # constants (x2 buffers)
                   + hop * wop * 4                                  # plane accumulator
                   + 2 * 8 * 128 * 4)                               # output block (x2)
    b = _choose_block(num_packed, per_pack_bytes, fixed_bytes, vmem_budget)
    num_blocks = num_packed // b

    per_pack_temp_bytes = (5 * hp * gw + 5 * hp * wop + 9 * hop * wop) * 4
    unroll = b if per_pack_temp_bytes < (256 << 10) else min(b, 2)

    c1 = float((K1 * DATA_RANGE) ** 2)
    c2 = float((K2 * DATA_RANGE) ** 2)

    kernel = functools.partial(_ssim_kernel, b=b, fused=fused, hp=hp, hop=hop,
                               ho=ho, wo_valid=wo_valid, wop=wop, c1=c1, c2=c2,
                               unroll=unroll)

    partial = pl.pallas_call(
        kernel,
        out_shape=jax.ShapeDtypeStruct((num_blocks, 8, 128), jnp.float32),
        grid_spec=pltpu.PrefetchScalarGridSpec(
            num_scalar_prefetch=0,
            grid=(num_blocks,),
            in_specs=[
                pl.BlockSpec((b, hp, gw), lambda i: (i, 0, 0)),
                pl.BlockSpec((b, hp, gw), lambda i: (i, 0, 0)),
                pl.BlockSpec(tuple(kh.shape), lambda i: (0, 0)),
                pl.BlockSpec(tuple(kwt.shape), lambda i: (0, 0)),
            ],
            out_specs=pl.BlockSpec((1, 8, 128), lambda i: (i, 0, 0)),
            scratch_shapes=[pltpu.VMEM((hop, wop), jnp.float32)],
        ),
        compiler_params=pltpu.CompilerParams(
            dimension_semantics=("parallel",),
            vmem_limit_bytes=int(vmem_limit),
        ),
    )(x, y, jnp.asarray(kh), jnp.asarray(kwt))

    inv_n = 1.0 / float(num_images * ho * wo)
    return 1.0 - jnp.sum(partial[:, 0, 0]) * inv_n


def _ssim_loss_ref(preds, targets):
    # pure-JAX reference (same math) for a sanity check
    n, c, h, w = preds.shape
    ho, wo = h - KERNEL_SIZE + 1, w - KERNEL_SIZE + 1
    g = _gaussian_1d()
    kh = jnp.asarray(_band_matrix(ho, h, g))
    kw = jnp.asarray(_band_matrix(wo, w, g))
    x = preds.reshape(n * c, h, w).astype(jnp.float32)
    y = targets.reshape(n * c, h, w).astype(jnp.float32)

    def gfilt(m):
        return jnp.einsum('ah,bhw,cw->bac', kh, m, kw)

    mu_x, mu_y = gfilt(x), gfilt(y)
    e_xx, e_yy, e_xy = gfilt(x * x), gfilt(y * y), gfilt(x * y)
    sx2, sy2, sxy = e_xx - mu_x ** 2, e_yy - mu_y ** 2, e_xy - mu_x * mu_y
    c1 = (K1 * DATA_RANGE) ** 2
    c2 = (K2 * DATA_RANGE) ** 2
    ssim = ((2 * mu_x * mu_y + c1) * (2 * sxy + c2)) / \
           ((mu_x ** 2 + mu_y ** 2 + c1) * (sx2 + sy2 + c2))
    return 1.0 - jnp.mean(ssim)


if __name__ == "__main__":
    key = jax.random.PRNGKey(0)
    kp, kt = jax.random.split(key)
    shape = (2, 4, 16, 16)   # N, C, H, W (H, W must be >= the 11x11 window)
    preds = jax.random.uniform(kp, shape, dtype=jnp.float32)
    targets = jax.random.uniform(kt, shape, dtype=jnp.float32)

    loss = ssim_loss(preds, targets)
    jax.block_until_ready(loss)

    ref = _ssim_loss_ref(preds, targets)
    np.testing.assert_allclose(np.asarray(loss), np.asarray(ref),
                               rtol=2e-3, atol=2e-3)
    print("KERNEL_OK")
</pallas_src>

<mosaic_0001>
module attributes {stable_mosaic.version = 11 : i64} {
  func.func @_ssim_kernel(%arg0: i32, %arg1: memref<1x16x64xf32, #tpu.memory_space<vmem>>, %arg2: memref<1x16x64xf32, #tpu.memory_space<vmem>>, %arg3: memref<40x80xf32, #tpu.memory_space<vmem>>, %arg4: memref<64x128xf32, #tpu.memory_space<vmem>>, %arg5: memref<1x8x128xf32, #tpu.memory_space<vmem>>, %arg6: memref<8x128xf32, #tpu.memory_space<vmem>>) attributes {dimension_semantics = [#tpu.dimension_semantics<parallel>], iteration_bounds = array<i64: 2>, scalar_prefetch = 0 : i64, scratch_operands = 1 : i64, tpu.core_type = #tpu.core_type<tc>, window_params = [{transform_indices = @transform_0, window_bounds = array<i64: 1, 16, 64>}, {transform_indices = @transform_1, window_bounds = array<i64: 1, 16, 64>}, {pipeline_mode = #tpu.pipeline_mode<synchronous>, transform_indices = @transform_2, window_bounds = array<i64: 40, 80>}, {pipeline_mode = #tpu.pipeline_mode<synchronous>, transform_indices = @transform_3, window_bounds = array<i64: 64, 128>}, {transform_indices = @transform_4, window_bounds = array<i64: 1, 8, 128>}]} {
    %c0 = arith.constant 0 : index
    %c0_0 = arith.constant 0 : index
    %0 = vector.load %arg3[%c0, %c0_0] : memref<40x80xf32, #tpu.memory_space<vmem>>, vector<40x80xf32>
    %c0_1 = arith.constant 0 : index
    %c0_2 = arith.constant 0 : index
    %1 = vector.load %arg4[%c0_1, %c0_2] : memref<64x128xf32, #tpu.memory_space<vmem>>, vector<64x128xf32>
    %cst = arith.constant 0.000000e+00 : f32
    %2 = vector.broadcast %cst : f32 to vector<8x128xf32>
    %c0_3 = arith.constant 0 : index
    %c0_4 = arith.constant 0 : index
    %3 = vector.load %arg6[%c0_3, %c0_4] : memref<8x128xf32, #tpu.memory_space<vmem>>, vector<8x128xf32>
    tpu.vector_store %arg6[%c0_3, %c0_4], %2 {strides = array<i32>} : memref<8x128xf32, #tpu.memory_space<vmem>>, vector<8x128xf32>,
    %c0_i32 = arith.constant 0 : i32
    %4 = arith.index_cast %c0_i32 : i32 to index
    %c0_5 = arith.constant 0 : index
    %c0_6 = arith.constant 0 : index
    %5 = vector.load %arg1[%4, %c0_5, %c0_6] : memref<1x16x64xf32, #tpu.memory_space<vmem>>, vector<1x16x64xf32>
    %6 = vector.shape_cast %5 : vector<1x16x64xf32> to vector<16x64xf32>
    %7 = arith.index_cast %c0_i32 : i32 to index
    %c0_7 = arith.constant 0 : index
    %c0_8 = arith.constant 0 : index
    %8 = vector.load %arg2[%7, %c0_7, %c0_8] : memref<1x16x64xf32, #tpu.memory_space<vmem>>, vector<1x16x64xf32>
    %9 = vector.shape_cast %8 : vector<1x16x64xf32> to vector<16x64xf32>
    %10 = arith.mulf %6, %6 : vector<16x64xf32>
    %11 = arith.mulf %9, %9 : vector<16x64xf32>
    %12 = arith.mulf %6, %9 : vector<16x64xf32>
    %13 = tpu.concatenate %6, %9, %10, %11, %12 in 0 : vector<16x64xf32>, vector<16x64xf32>, vector<16x64xf32>, vector<16x64xf32>, vector<16x64xf32> -> vector<80x64xf32>
    %cst_9 = arith.constant dense<0.000000e+00> : vector<80x128xf32>
    %14 = tpu.matmul %13, %1, %cst_9 {dimension_numbers = #tpu.dot_dimension_numbers<[1], [0], [0], [1], [0, 0, 1, 1], [], []>} : vector<80x64xf32>, vector<64x128xf32>, vector<80x128xf32> -> vector<80x128xf32>
    %cst_10 = arith.constant dense<0.000000e+00> : vector<40x128xf32>
    %15 = tpu.matmul %0, %14, %cst_10 {dimension_numbers = #tpu.dot_dimension_numbers<[1], [0], [0], [1], [0, 0, 1, 1], [], []>} : vector<40x80xf32>, vector<80x128xf32>, vector<40x128xf32> -> vector<40x128xf32>
    %16 = vector.extract_strided_slice %15 {offsets = [0, 0], sizes = [8, 128], strides = [1, 1]} : vector<40x128xf32> to vector<8x128xf32>
    %17 = vector.extract_strided_slice %15 {offsets = [8, 0], sizes = [8, 128], strides = [1, 1]} : vector<40x128xf32> to vector<8x128xf32>
    %18 = vector.extract_strided_slice %15 {offsets = [16, 0], sizes = [8, 128], strides = [1, 1]} : vector<40x128xf32> to vector<8x128xf32>
    %19 = vector.extract_strided_slice %15 {offsets = [24, 0], sizes = [8, 128], strides = [1, 1]} : vector<40x128xf32> to vector<8x128xf32>
    %20 = vector.extract_strided_slice %15 {offsets = [32, 0], sizes = [8, 128], strides = [1, 1]} : vector<40x128xf32> to vector<8x128xf32>
    %21 = arith.mulf %16, %16 : vector<8x128xf32>
    %22 = arith.mulf %17, %17 : vector<8x128xf32>
    %23 = arith.mulf %16, %17 : vector<8x128xf32>
    %cst_11 = arith.constant 2.000000e+00 : f32
    %24 = vector.broadcast %cst_11 : f32 to vector<8x128xf32>
    %25 = arith.mulf %24, %23 : vector<8x128xf32>
    %cst_12 = arith.constant 9.99999974E-5 : f32
    %26 = vector.broadcast %cst_12 : f32 to vector<8x128xf32>
    %27 = arith.addf %25, %26 : vector<8x128xf32>
    %28 = arith.subf %20, %23 : vector<8x128xf32>
    %cst_13 = arith.constant 2.000000e+00 : f32
    %29 = vector.broadcast %cst_13 : f32 to vector<8x128xf32>
    %30 = arith.mulf %29, %28 : vector<8x128xf32>
    %cst_14 = arith.constant 8.99999984E-4 : f32
    %31 = vector.broadcast %cst_14 : f32 to vector<8x128xf32>
    %32 = arith.addf %30, %31 : vector<8x128xf32>
    %33 = arith.mulf %27, %32 : vector<8x128xf32>
    %34 = arith.addf %21, %22 : vector<8x128xf32>
    %cst_15 = arith.constant 9.99999974E-5 : f32
    %35 = vector.broadcast %cst_15 : f32 to vector<8x128xf32>
    %36 = arith.addf %34, %35 : vector<8x128xf32>
    %37 = arith.subf %18, %21 : vector<8x128xf32>
    %38 = arith.addf %37, %19 : vector<8x128xf32>
    %39 = arith.subf %38, %22 : vector<8x128xf32>
    %cst_16 = arith.constant 8.99999984E-4 : f32
    %40 = vector.broadcast %cst_16 : f32 to vector<8x128xf32>
    %41 = arith.addf %39, %40 : vector<8x128xf32>
    %42 = arith.mulf %36, %41 : vector<8x128xf32>
    %43 = tpu.reciprocal %42 {approx = true} : vector<8x128xf32> -> vector<8x128xf32>
    %44 = arith.mulf %42, %43 : vector<8x128xf32>
    %cst_17 = arith.constant 2.000000e+00 : f32
    %45 = vector.broadcast %cst_17 : f32 to vector<8x128xf32>
    %46 = arith.subf %45, %44 : vector<8x128xf32>
    %47 = arith.mulf %43, %46 : vector<8x128xf32>
    %c0_18 = arith.constant 0 : index
    %c0_19 = arith.constant 0 : index
    %48 = vector.load %arg6[%c0_18, %c0_19] : memref<8x128xf32, #tpu.memory_space<vmem>>, vector<8x128xf32>
    %49 = arith.mulf %33, %47 : vector<8x128xf32>
    %50 = arith.addf %48, %49 : vector<8x128xf32>
    %c0_20 = arith.constant 0 : index
    %c0_21 = arith.constant 0 : index
    %51 = vector.load %arg6[%c0_20, %c0_21] : memref<8x128xf32, #tpu.memory_space<vmem>>, vector<8x128xf32>
    tpu.vector_store %arg6[%c0_20, %c0_21], %50 {strides = array<i32>} : memref<8x128xf32, #tpu.memory_space<vmem>>, vector<8x128xf32>,
    %c1_i32 = arith.constant 1 : i32
    %52 = tpu.iota {dimensions = array<i32: 0>} : vector<8x128xi32>
    %53 = tpu.iota {dimensions = array<i32: 1>} : vector<8x128xi32>
    %c6_i32 = arith.constant 6 : i32
    %54 = vector.broadcast %c6_i32 : i32 to vector<8x128xi32>
    %55 = arith.cmpi slt, %52, %54 : vector<8x128xi32>
    %c24_i32 = arith.constant 24 : i32
    %56 = vector.broadcast %c24_i32 : i32 to vector<8x128xi32>
    %57 = arith.cmpi slt, %53, %56 : vector<8x128xi32>
    %58 = arith.andi %55, %57 : vector<8x128xi1>
    %c0_22 = arith.constant 0 : index
    %c0_23 = arith.constant 0 : index
    %59 = vector.load %arg6[%c0_22, %c0_23] : memref<8x128xf32, #tpu.memory_space<vmem>>, vector<8x128xf32>
    %cst_24 = arith.constant 0.000000e+00 : f32
    %60 = vector.broadcast %cst_24 : f32 to vector<8x128xf32>
    %61 = arith.select %58, %59, %60 : vector<8x128xi1>, vector<8x128xf32>
    %62 = vector.shape_cast %61 : vector<8x128xf32> to vector<1x8x128xf32>
    %cst_25 = arith.constant dense<0.000000e+00> : vector<1xf32>
    %63 = vector.multi_reduction <add>, %62, %cst_25 [1, 2] : vector<1x8x128xf32> to vector<1xf32>
    %64 = vector.shape_cast %63 : vector<1xf32> to vector<1x1x1xf32>
    %65 = vector.extract %64[0, 0, 0] : f32 from vector<1x1x1xf32>
    %66 = vector.broadcast %65 : f32 to vector<1x1x1xf32>
    %67 = vector.shape_cast %66 : vector<1x1x1xf32> to vector<1x1x1xf32>
    %68 = vector.broadcast %67 : vector<1x1x1xf32> to vector<1x8x128xf32>
    %c0_26 = arith.constant 0 : index
    %c0_27 = arith.constant 0 : index
    %c0_28 = arith.constant 0 : index
    %69 = vector.load %arg5[%c0_26, %c0_27, %c0_28] : memref<1x8x128xf32, #tpu.memory_space<vmem>>, vector<1x8x128xf32>
    tpu.vector_store %arg5[%c0_26, %c0_27, %c0_28], %68 {strides = array<i32>} : memref<1x8x128xf32, #tpu.memory_space<vmem>>, vector<1x8x128xf32>,
    return
  }
  func.func @transform_0(%arg0: i32) -> (i32, i32, i32) {
    %c0_i32 = arith.constant 0 : i32
    %c0_i32_0 = arith.constant 0 : i32
    %c0_i32_1 = arith.constant 0 : i32
    return %arg0, %c0_i32, %c0_i32_0 : i32, i32, i32
  }
  func.func @transform_1(%arg0: i32) -> (i32, i32, i32) {
    %c0_i32 = arith.constant 0 : i32
    %c0_i32_0 = arith.constant 0 : i32
    %c0_i32_1 = arith.constant 0 : i32
    return %arg0, %c0_i32, %c0_i32_0 : i32, i32, i32
  }
  func.func @transform_2(%arg0: i32) -> (i32, i32) {
    %c0_i32 = arith.constant 0 : i32
    %c0_i32_0 = arith.constant 0 : i32
    %c0_i32_1 = arith.constant 0 : i32
    return %c0_i32, %c0_i32_0 : i32, i32
  }
  func.func @transform_3(%arg0: i32) -> (i32, i32) {
    %c0_i32 = arith.constant 0 : i32
    %c0_i32_0 = arith.constant 0 : i32
    %c0_i32_1 = arith.constant 0 : i32
    return %c0_i32, %c0_i32_0 : i32, i32
  }
  func.func @transform_4(%arg0: i32) -> (i32, i32, i32) {
    %c0_i32 = arith.constant 0 : i32
    %c0_i32_0 = arith.constant 0 : i32
    %c0_i32_1 = arith.constant 0 : i32
    return %arg0, %c0_i32, %c0_i32_0 : i32, i32, i32
  }
}

</mosaic_0001>

<bundles_post_ra>
// kernel: tpu_custom_call.1
= control target key start
LH: loop header
LB: loop body
LE: loop exit
PB: predicated region body
PF: predicated region fallthrough
CT: control target
= control target key end

     0   :  { %s1525_s0 = inlined_call_operand.hbm [shape: f32[2,16,64], index: 0, kind: input, shape index: {}]   ;;  %s1526_s1 = inlined_call_operand.hbm [shape: f32[2,16,64], index: 1, kind: input, shape index: {}]   ;;  %s1527_s2 = inlined_call_operand.hbm [shape: f32[40,80], index: 2, kind: input, shape index: {}]   ;;  %s1528_s3 = inlined_call_operand.hbm [shape: f32[64,128], index: 3, kind: input, shape index: {}]   ;;  %s1529_s4 = inlined_call_operand.hbm [shape: f32[2,8,128], index: 4, kind: output, shape index: {}]  }
   0x1   :  { %1537 = sst [smem:[#allocation17_spill]] %s1525_s0 }
   0x2   :  { %9 = vsyncpa [#allocation4], 0 }
   0x3   :  { %11 = vsyncpa [#allocation4 + $0x1], 0 }
   0x4   :  { %12 = vsyncpa [#allocation7], 0 }
   0x5   :  { %14 = vsyncpa [#allocation7 + $0x1], 0 }
   0x6   :  { %15 = vsyncpa [#allocation10], 0 }
   0x7   :  { %16 = vsyncpa [#allocation5], 0 }
   0x8   :  { %18 = vsyncpa [#allocation5 + $0x1], 0  ;;  %s1211_s15 = smov 0   ;;  %s1213_s16 = smov 0  }
   0x9   :  { %s1215_s17 = smov 0   ;;  %s1217_s18 = smov 0  }
   0xa LB: > { %s1232_s19 = sadd.s32 4294967295, %s1174_s18   ;;  %s731_s20 = sadd.s32 4294967294, %s1174_s18   ;;  %s1174_s18 = sphi %s1217_s18, %s1559_s18   ;;  %s1170_s17 = sphi %s1215_s17, %s1558_s17   ;;  %s1166_s16 = sphi %s1213_s16, %s1557_s16   ;;  %s1162_s15 = sphi %s1211_s15, %s1556_s15  }
   0xb   : > { %p44_p0 = scmp.ne.s32.totalorder %s1166_s16, %s1162_s15  ;;  %p1530_p1 = scmp.eq.s32.totalorder %s1232_s19, 0 }
   0xc   : > { %p142_p3 = scmp.eq.s32.totalorder %s731_s20, 1  ;;  %p732_p5 = scmp.ge.s32.totalorder %s1174_s18, 1 }
   0xd   : > { %p1241_p4 = por %p1530_p1, %p44_p0  ;;  %p149_p7 = scmp.lt.s32.totalorder %s1174_s18, 3 }
   0xe   : > { %p1246_p6 = por %p142_p3, %p44_p0  ;;  %s1176_s24 = smov [#allocation8]  }
   0xf   : > { %s1538_s21 = scalar_select %p1241_p4, 1, 0 }
  0x10   : > { %s1539_s22 = scalar_select %p1246_p6, 1, 0 }
  0x11   : > { %p1251_p8 = pnand %p732_p5, %p149_p7  ;;  %s161_s25 = sshll.u32 %s1176_s24, 4  ;;  %s1255_s25 = int_to_ptr.vmem [resolvable:$true] %s161_s25 }
  0x12   : > { %s1177_s27 = smov [#allocation9]   ;;  %s980_s5 = scalar_lea.hbm %s1527_s2, 640 }
  0x13   : > { %p915_p9 = pneg %p1251_p8  ;;  %s174_s28 = sshll.u32 %s1177_s27, 4  ;;  %s1266_s28 = int_to_ptr.vmem [resolvable:$true] %s174_s28 }
  0x14   : > { %p981_p12 = scmp.ne.s32.totalorder %s1527_s2, %s980_s5  ;;  %p987_p5 = scmp.lt.u32.totalorder %s980_s5, %s1527_s2 }
  0x15   : > { %p1262_p11 = pnand %p915_p9, %p1530_p1 }
  0x17   : > { %p982_p13 = pneg %p1262_p11 }
  0x19   : > { %p983_p0 = pnand %p982_p13, %p981_p12 }
  0x1b   : > { %p984_p3 = pneg %p983_p0 }
  0x1d   : > { %p989_p7 = pnand %p987_p5, %p984_p3 }
  0x1f   : > { %992 = shalt.err (!%p989_p7)
}
  0x20   : > { %s993_s10 = scalar_lea.vmem %s1255_s25, 640  ;;  %p1001_p2 = scmp.lt.s32.totalorder %s1255_s25, %s1255_s25 }
  0x21   : > { %p994_p9 = scmp.ne.s32.totalorder %s1255_s25, %s993_s10  ;;  %p1002_p12 = scmp.lt.s32.totalorder %s993_s10, %s993_s10 }
  0x23   : > { %p996_p10 = pnand %p994_p9, %p982_p13  ;;  %p1003_p0 = por %p1002_p12, %p1001_p2 }
  0x25   : > { %p997_p1 = pneg %p996_p10 }
  0x27   : > { %p1004_p6 = pnand %p1003_p0, %p997_p1 }
  0x29   : > { %1007 = shalt.err (!%p1004_p6)
}
  0x2a   : > { %s1531_s11 = smov 128   ;;  %s1533_s12 = smov 8  }
  0x2b   : > { %918 = dma.hbm_to_vmem [thread:$0]  (!%p1262_p11), %s1527_s2, 640, %s1255_s25, [#allocation7], %s1531_s11, %s1531_s11, %s1533_s12  }
  0x2c   : > { %s1008_s27 = scalar_lea.hbm %s1528_s3, 1024 }
  0x2d   : > { %p1009_p1 = scmp.ne.s32.totalorder %s1528_s3, %s1008_s27  ;;  %p1015_p10 = scmp.lt.u32.totalorder %s1008_s27, %s1528_s3 }
  0x2f   : > { %p1011_p2 = pnand %p1009_p1, %p982_p13 }
  0x31   : > { %p1012_p6 = pneg %p1011_p2 }
  0x33   : > { %p1017_p3 = pnand %p1015_p10, %p1012_p6 }
  0x35   : > { %1020 = shalt.err (!%p1017_p3)
}
  0x36   : > { %s1021_s25 = scalar_lea.vmem %s1266_s28, 1024  ;;  %p1029_p12 = scmp.lt.s32.totalorder %s1266_s28, %s1266_s28 }
  0x37   : > { %p1022_p5 = scmp.ne.s32.totalorder %s1266_s28, %s1021_s25  ;;  %p1030_p0 = scmp.lt.s32.totalorder %s1021_s25, %s1021_s25 }
  0x39   : > { %p1024_p7 = pnand %p1022_p5, %p982_p13  ;;  %p1031_p1 = por %p1030_p0, %p1029_p12 }
  0x3b   : > { %p1025_p9 = pneg %p1024_p7 }
  0x3d   : > { %p1032_p2 = pnand %p1031_p1, %p1025_p9 }
  0x3f   : > { %1035 = shalt.err (!%p1032_p2)
}
  0x40   : > { %921 = dma.hbm_to_vmem [thread:$0]  (!%p1262_p11), %s1528_s3, 1024, %s1266_s28, [#allocation10], %s1531_s11, %s1531_s11, %s1533_s12  }
  0x41   : > { %s1327_s26 = sadd.s32 1, %s1174_s18   ;;  %s31_s9 = sadd.s32 1, %s1170_s17 }
  0x42   : > { %s28_s10 = ssub.s32 %s1174_s18, %s1327_s26  ;;  %p38_p13 = scmp.ne.s32.totalorder %s1170_s17, %s1166_s16 }
  0x43   : > { %p29_p6 = scmp.eq.s32.totalorder %s28_s10, 0  ;;  %p39_p10 = scmp.eq.s32.totalorder %s1174_s18, 0 }
  0x44   : > { %p1542_p3 = scmp.eq.s32.totalorder %s1232_s19, 1  ;;  %p935_p7 = scmp.lt.s32.totalorder %s1174_s18, 2 }
  0x45   : > { %s1343_s14 = scalar_select %p29_p6, %s1170_s17, %s31_s9  }
  0x46   : > { %p1337_p5 = por %p1542_p3, %p38_p13  ;;  %p40_p9 = por %p39_p10, %p38_p13 }
  0x47   : > { %s188_s20 = sand.u32 1, %s1170_s17   ;;  %s767_s28 = sshll.u32 %s1174_s18, 8 }
  0x48   : > { %s1543_s13 = scalar_select %p1337_p5, 1, 0 }
  0x49   : > { %s736_s24 = sshll.u32 %s188_s20, 4  ;;  %s1544_s0 = sld [smem:[#allocation17_spill]] }
  0x4a   : > { %s192_s5 = scalar_lea.vmem [#allocation3], %s736_s24  ;;  %p1354_p11 = pnand %p935_p7, %p40_p9 }
  0x4b   : > { %s199_s6 = sshll.u32 %s192_s5, 4  ;;  %s1361_s9 = scalar_lea.hbm %s1526_s1, %s767_s28  ;;  %s1352_s6 = int_to_ptr.vmem [resolvable:$true] %s199_s6 }
  0x4c   : > { %s213_s10 = scalar_lea.vmem [#allocation6], %s736_s24  ;;  %s1365_s29 = scalar_lea.sflag [#allocation4], %s188_s20 }
  0x4d   : > { %s1363_s27 = sshll.u32 %s213_s10, 4  ;;  %p1038_p0 = pneg %p1354_p11  ;;  %s1397_s27 = int_to_ptr.vmem [resolvable:$true] %s1363_s27 }
  0x4f   : > { %s1350_s30 = scalar_lea.hbm %s1544_s0, %s767_s28  ;;  %s1041_s7 = scalar_lea.hbm %s1544_s0, 512 }
  0x50   : > { %s1036_s5 = scalar_lea.hbm %s1350_s30, 256  ;;  %p1042_p13 = scmp.lt.u32.totalorder %s1350_s30, %s1544_s0 }
  0x51   : > { %p1037_p12 = scmp.ne.s32.totalorder %s1350_s30, %s1036_s5  ;;  %p1043_p6 = scmp.lt.u32.totalorder %s1041_s7, %s1036_s5 }
  0x52   : > { %p1045_p3 = scmp.lt.u32.totalorder %s1036_s5, %s1350_s30 }
  0x53   : > { %p1039_p1 = pnand %p1038_p0, %p1037_p12  ;;  %p1044_p10 = por %p1043_p6, %p1042_p13 }
  0x55   : > { %p1040_p2 = pneg %p1039_p1  ;;  %p1046_p7 = por %p1045_p3, %p1044_p10 }
  0x57   : > { %p1047_p9 = pnand %p1046_p7, %p1040_p2 }
  0x59   : > { %1050 = shalt.err (!%p1047_p9)
}
  0x5a   : > { %s1051_s20 = scalar_lea.vmem %s1352_s6, 256  ;;  %s1180_s11 = smov [#allocation3]  }
  0x5b   : > { %p1052_p12 = scmp.ne.s32.totalorder %s1352_s6, %s1051_s20  ;;  %s1056_s12 = sshll.u32 %s1180_s11, 4  ;;  %s1057_s12 = int_to_ptr.vmem [resolvable:$false] %s1056_s12 }
  0x5c   : > { %s1058_s24 = scalar_lea.vmem %s1057_s12, 512  ;;  %p1059_p4 = scmp.lt.s32.totalorder %s1352_s6, %s1057_s12 }
  0x5d   : > { %p1054_p1 = pnand %p1052_p12, %p1038_p0  ;;  %p1060_p13 = scmp.lt.s32.totalorder %s1058_s24, %s1051_s20 }
  0x5f   : > { %p1055_p5 = pneg %p1054_p1  ;;  %p1061_p6 = por %p1060_p13, %p1059_p4 }
  0x61   : > { %p1062_p10 = pnand %p1061_p6, %p1055_p5 }
  0x63   : > { %1065 = shalt.err (!%p1062_p10)
}
  0x64   : > { %s1546_s10 = smov 8   ;;  %s1547_s5 = smov 128  }
  0x65   : > { %925 = dma.hbm_to_vmem [thread:$0]  (!%p1354_p11), %s1350_s30, 256, %s1352_s6, %s1365_s29, %s1547_s5, %s1547_s5, %s1546_s10  }
  0x66   : > { %s209_s7 = sand.u32 1, %s1174_s18   ;;  %s1066_s28 = scalar_lea.hbm %s1361_s9, 256 }
  0x67   : > { %s1400_s8 = scalar_lea.sflag [#allocation7], %s209_s7  ;;  %p1067_p4 = scmp.ne.s32.totalorder %s1361_s9, %s1066_s28 }
  0x68   : > { %s1071_s12 = scalar_lea.hbm %s1526_s1, 512  ;;  %p1072_p3 = scmp.lt.u32.totalorder %s1361_s9, %s1526_s1 }
  0x69   : > { %p1069_p5 = pnand %p1067_p4, %p1038_p0  ;;  %p1073_p7 = scmp.lt.u32.totalorder %s1071_s12, %s1066_s28 }
  0x6a   : > { %p1075_p12 = scmp.lt.u32.totalorder %s1066_s28, %s1361_s9 }
  0x6b   : > { %p1070_p2 = pneg %p1069_p5  ;;  %p1074_p9 = por %p1073_p7, %p1072_p3 }
  0x6d   : > { %p1076_p1 = por %p1075_p12, %p1074_p9 }
  0x6f   : > { %p1077_p13 = pnand %p1076_p1, %p1070_p2 }
  0x71   : > { %1080 = shalt.err (!%p1077_p13)
}
  0x72   : > { %s1081_s30 = scalar_lea.vmem %s1397_s27, 256  ;;  %s1181_s6 = smov [#allocation6]  }
  0x73   : > { %p1082_p6 = scmp.ne.s32.totalorder %s1397_s27, %s1081_s30  ;;  %s1086_s29 = sshll.u32 %s1181_s6, 4  ;;  %s1087_s29 = int_to_ptr.vmem [resolvable:$false] %s1086_s29 }
  0x74   : > { %s1088_s0 = scalar_lea.vmem %s1087_s29, 512  ;;  %p1089_p5 = scmp.lt.s32.totalorder %s1397_s27, %s1087_s29 }
  0x75   : > { %p1084_p10 = pnand %p1082_p6, %p1038_p0  ;;  %p1090_p3 = scmp.lt.s32.totalorder %s1088_s0, %s1081_s30 }
  0x77   : > { %p1085_p4 = pneg %p1084_p10  ;;  %p1091_p7 = por %p1090_p3, %p1089_p5 }
  0x79   : > { %p1092_p9 = pnand %p1091_p7, %p1085_p4 }
  0x7b   : > { %1095 = shalt.err (!%p1092_p9)
}
  0x7c   : > { %928 = dma.hbm_to_vmem [thread:$0]  (!%p1354_p11), %s1361_s9, 256, %s1397_s27, %s1400_s8, %s1547_s5, %s1547_s5, %s1546_s10  }
  0x7d   : > { %232 = sbr.rel (%p1251_p8) target bundleno = 866 (0x362), region = 36  ;;  %s1432_s7 = sand.u32 (!%p1251_p8), 1, %s1166_s16  }
  0x7e   : > { %s743_s28 = sshll.u32 (!%p1251_p8), %s1432_s7, 4  ;;  %s235_s20 = scalar_lea.sflag (!%p1251_p8), [#allocation4], %s1432_s7 }
  0x7f   : > { %s1436_s11 = scalar_lea.vmem (!%p1251_p8), [#allocation3], %s743_s28  ;;  %p1548_p0 = scmp.ne.s32.totalorder (!%p1251_p8), %s1538_s21, 0 }
  0x84   : > { %1141 = dma.done.wait (%p1548_p0), %s235_s20, 256  }
  0x85   : > { %1143 = vsyncadd (%p1548_p0), %s235_s20, 4294967040  ;;  %s243_s25 = sand.u32 1, %s1232_s19   ;;  %s1443_s9 = scalar_lea.vmem [#allocation6], %s743_s28 }
  0x86   : > { %s244_s23 = scalar_lea.sflag [#allocation7], %s243_s25 }
  0x87   : > { %1145 = dma.done.wait (%p1548_p0), %s244_s23, 256  }
  0x88   : > { %1147 = vsyncadd (%p1548_p0), %s244_s23, 4294967040  ;;  %p1549_p8 = scmp.eq.s32.totalorder %s1232_s19, 0 }
  0x8a   : > { %1149 = dma.done.wait (%p1549_p8), [#allocation7], 640   ;;  %p1550_p11 = pmov %p1549_p8 }
  0x8b   : > { %p1551_p2 = pmov %p1549_p8 }
  0x8c   : > { %1151 = vsyncadd (%p1550_p11), [#allocation7], 4294966656 }
  0x8d   : > { %1153 = dma.done.wait (%p1551_p2), [#allocation10], 1024   ;;  %p1552_p12 = pmov %p1551_p2 }
  0x8e   : > { %v290_v0 = vld [vmem:[#allocation9] sm:$0xff]  ;;  %v291_v1 = vld [vmem:[#allocation9 + $0x8] sm:$0xff]  ;;  %v292_v2 = vld [vmem:[#allocation9 + $0x10] sm:$0xff]  ;;  %vm309_vm0 = vcmask 523264   ;;  %v1182_v22 = vmov 0.0|0.0   ;;  %vm1183_vm1 = vmmov 0  }
  0x8f   : > { %1155 = vsyncadd (%p1552_p12), [#allocation10], 4294966272  ;;  %v868_v3 = vpack.c.bf16 %v291_v1, %v290_v0  ;;  %v293_v4 = vld [vmem:[#allocation9 + $0x18] sm:$0xff]  ;;  %v294_v6 = vld [vmem:[#allocation9 + $0x20] sm:$0xff]  ;;  %884 = vmatprep.subr.bf16.mxu1 %v1182_v22  ;;  %v1184_v23 = vmov 0.0   ;;  %vm455_vm2 = vcmask 654336  }
  0x90   : > { %v872_v5 = vpack.c.bf16 %v293_v4, %v292_v2  ;;  %v295_v7 = vld [vmem:[#allocation9 + $0x28] sm:$0xff]  ;;  %v296_v10 = vld [vmem:[#allocation9 + $0x30] sm:$0xff]  ;;  %v297_v11 = vld [vmem:[#allocation9 + $0x38] sm:$0xff]  ;;  %853 = vmatprep.mubr.msk.f32.mxu1 %vm1183_vm1, %v1184_v23  ;;  %s747_s21 = sshll.u32 %s1432_s7, 3  ;;  %s764_s5 = sshll.u32 %s1232_s19, 7 }
  0x91   : > { %v299_v8 = vld [vmem:[%s1436_s11] sm:$0xff]  ;;  %869 = vmatprep.subr.bf16.mxu0 %v868_v3  ;;  %v876_v9 = vpack.c.bf16 %v295_v7, %v294_v6  ;;  %v880_v12 = vpack.c.bf16 %v297_v11, %v296_v10  ;;  %v300_v13 = vld [vmem:[%s1436_s11 + $0x8] sm:$0xff]  ;;  %v585_v6 = vlaneseq  ;;  %s284_s27 = scalar_lea.vmem [#allocation11], %s747_s21  ;;  %s1483_s30 = scalar_lea.hbm %s1529_s4, %s764_s5 }
  0x92   : > { %818 = vmatprep.mubr.msk.f32.mxu0 %vm309_vm0, %v299_v8  ;;  %871 = vmatpush3.bf16.msra.mxu0 %v868_v3  ;;  %v301_v14 = vld [vmem:[%s1443_s9] sm:$0xff]  ;;  %v303_v15 = vmul.f32 %v299_v8, %v299_v8  ;;  %v302_v16 = vld [vmem:[%s1443_s9 + $0x8] sm:$0xff]  ;;  %v304_v17 = vmul.f32 %v300_v13, %v300_v13  ;;  %s619_s10 = sshll.u32 %s284_s27, 4  ;;  %s606_s6 = scalar_lea.sflag [#allocation5], %s1432_s7  ;;  %s1478_s10 = int_to_ptr.vmem [resolvable:$true] %s619_s10 }
  0x93   : > { %873 = vmatprep.subr.bf16.mxu0 %v872_v5  ;;  %v305_v18 = vmul.f32 %v301_v14, %v301_v14  ;;  %v306_v19 = vmul.f32 %v302_v16, %v302_v16  ;;  %v307_v20 = vmul.f32 %v301_v14, %v299_v8  ;;  %v308_v21 = vmul.f32 %v302_v16, %v300_v13  ;;  %v285_v39 = vld [vmem:[#allocation8] sm:$0xff]  ;;  %v286_v40 = vld [vmem:[#allocation8 + $0x8] sm:$0xff]  ;;  %v287_v41 = vld [vmem:[#allocation8 + $0x10] sm:$0xff]  ;;  %s1096_s29 = scalar_lea.vmem %s1478_s10, 128  ;;  %p1553_p13 = scmp.ne.s32.totalorder %s1543_s13, 0 }
  0x94   : > { %v288_v42 = vld [vmem:[#allocation8 + $0x18] sm:$0xff]  ;;  %v289_v43 = vld [vmem:[#allocation8 + $0x20] sm:$0xff]  ;;  %v586_v7 = vshrl.u32 %v585_v6, 7  ;;  %v588_v8 = vand.u32 127, %v585_v6  ;;  %p1097_p1 = scmp.ne.s32.totalorder %s1478_s10, %s1096_s29  ;;  %s1185_s19 = smov [#allocation11]  }
  0x95   : > { %s1100_s0 = sshll.u32 %s1185_s19, 4  ;;  %s1101_s0 = int_to_ptr.vmem [resolvable:$false] %s1100_s0 }
  0x96   : > { %875 = vmatpush3.bf16.msra.mxu0 %v872_v5  ;;  %vm589_vm3 = vcmp.lt.s32.totalorder %v586_v7, 6  ;;  %vm590_vm4 = vcmp.lt.s32.totalorder %v588_v8, 24  ;;  %p1098_p6 = pnand %p1097_p1, %p1553_p13  ;;  %s1102_s28 = scalar_lea.vmem %s1101_s0, 256 }
  0x97   : > { %877 = vmatprep.subr.bf16.mxu0 %v876_v9  ;;  %vm591_vm5 = vmand %vm589_vm3, %vm590_vm4  ;;  %p1103_p4 = scmp.lt.s32.totalorder %s1478_s10, %s1101_s0  ;;  %p1104_p5 = scmp.lt.s32.totalorder %s1102_s28, %s1096_s29 }
  0x98   : > { %p1099_p10 = pneg %p1098_p6 }
  0x99   : > { %p1105_p3 = por %p1104_p5, %p1103_p4 }
  0x9a   : > { %879 = vmatpush3.bf16.msra.mxu0 %v876_v9 }
  0x9b   : > { %881 = vmatprep.subr.bf16.mxu0 %v880_v12  ;;  %p1106_p7 = pnand %p1105_p3, %p1099_p10 }
  0x9e   : > { %883 = vmatpush3.bf16.msra.mxu0 %v880_v12 }
  0xa1   : > { %819 = vmatmul.mubr.msk.f32.vlgmr.msra.gmra.mrb[0].mxu0 %vm309_vm0, %v300_v13 }
  0xa2   : > { %821 = vmatprep.mubr.msk.f32.mxu0 %vm309_vm0, %v301_v14 }
  0xa5   : > { %822 = vmatmul.mubr.msk.f32.gmra.mrb[2].mxu0 %vm309_vm0, %v302_v16 }
  0xa6   : > { %824 = vmatprep.mubr.msk.f32.mxu0 %vm309_vm0, %v303_v15 }
  0xa9   : > { %825 = vmatmul.mubr.msk.f32.gmra.mrb[4].mxu0 %vm309_vm0, %v304_v17 }
  0xaa   : > { %827 = vmatprep.mubr.msk.f32.mxu0 %vm309_vm0, %v305_v18 }
  0xad   : > { %828 = vmatmul.mubr.msk.f32.gmra.mrb[6].mxu0 %vm309_vm0, %v306_v19 }
  0xae   : > { %830 = vmatprep.mubr.msk.f32.mxu0 %vm309_vm0, %v307_v20 }
  0xb1   : > { %831 = vmatmul.mubr.msk.f32.gmra.mrb[8].mxu0 %vm309_vm0, %v308_v21 }
 0x174   : > { %v820_v24 = vpop.f32.mrb[0].mxu0 }
 0x175   : > { %v406_v25 = vpop.f32.mrb[1].mxu0 }
 0x176   : > { %v885_v26 = vpack.c.bf16 %v820_v24, %v406_v25 }
 0x178   : > { %v823_v27 = vpop.f32.mrb[2].mxu0  ;;  %886 = vmatpush3.bf16.msra.mxu1 %v885_v26 }
 0x179   : > { %v416_v28 = vpop.f32.mrb[3].mxu0  ;;  %887 = vmatprep.subr.bf16.mxu1 %v1182_v22 }
 0x17a   : > { %v888_v29 = vpack.c.bf16 %v823_v27, %v416_v28 }
 0x17c   : > { %v826_v30 = vpop.f32.mrb[4].mxu0  ;;  %889 = vmatpush3.bf16.msra.mxu1 %v888_v29 }
 0x17d   : > { %v426_v31 = vpop.f32.mrb[5].mxu0  ;;  %890 = vmatprep.subr.bf16.mxu1 %v1182_v22 }
 0x17e   : > { %v891_v32 = vpack.c.bf16 %v826_v30, %v426_v31 }
 0x180   : > { %v829_v33 = vpop.f32.mrb[6].mxu0  ;;  %892 = vmatpush3.bf16.msra.mxu1 %v891_v32 }
 0x181   : > { %v436_v34 = vpop.f32.mrb[7].mxu0  ;;  %893 = vmatprep.subr.bf16.mxu1 %v1182_v22 }
 0x182   : > { %v894_v35 = vpack.c.bf16 %v829_v33, %v436_v34 }
 0x184   : > { %v832_v36 = vpop.f32.mrb[8].mxu0  ;;  %895 = vmatpush3.bf16.msra.mxu1 %v894_v35 }
 0x185   : > { %v446_v37 = vpop.f32.mrb[9].mxu0  ;;  %896 = vmatprep.subr.bf16.mxu1 %v1182_v22 }
 0x186   : > { %v897_v38 = vpack.c.bf16 %v832_v36, %v446_v37 }
 0x188   : > { %898 = vmatpush3.bf16.msra.mxu1 %v897_v38 }
 0x18b   : > { %854 = vmatmul.mubr.msk.f32.vlgmr.msra.gmra.mrb[0].mxu1 %vm455_vm2, %v285_v39 }
 0x18c   : > { %856 = vmatprep.mubr.msk.f32.mxu1 %vm1183_vm1, %v1184_v23 }
 0x18f   : > { %857 = vmatmul.mubr.msk.f32.gmra.mrb[2].mxu1 %vm455_vm2, %v286_v40 }
 0x190   : > { %859 = vmatprep.mubr.msk.f32.mxu1 %vm1183_vm1, %v1184_v23 }
 0x193   : > { %860 = vmatmul.mubr.msk.f32.gmra.mrb[4].mxu1 %vm455_vm2, %v287_v41 }
 0x194   : > { %862 = vmatprep.mubr.msk.f32.mxu1 %vm1183_vm1, %v1184_v23 }
 0x197   : > { %863 = vmatmul.mubr.msk.f32.gmra.mrb[6].mxu1 %vm455_vm2, %v288_v42 }
 0x198   : > { %865 = vmatprep.mubr.msk.f32.mxu1 %vm1183_vm1, %v1184_v23 }
 0x19b   : > { %866 = vmatmul.mubr.msk.f32.gmra.mrb[8].mxu1 %vm455_vm2, %v289_v43 }
 0x25e   : > { %v537_v44 = vpop.f32.mrb[0].mxu1 }
 0x25f   : > { %v855_v45 = vpop.f32.mrb[1].mxu1  ;;  %v561_v47 = vmul.f32 %v537_v44, %v537_v44 }
 0x262   : > { %v542_v46 = vpop.f32.mrb[2].mxu1 }
 0x263   : > { %v562_v48 = vmul.f32 %v542_v46, %v542_v46  ;;  %v563_v49 = vmul.f32 %v542_v46, %v537_v44  ;;  %v858_v50 = vpop.f32.mrb[3].mxu1 }
 0x265   : > { %v570_v51 = vadd.f32 %v562_v48, %v561_v47  ;;  %v564_v60 = vmul.f32 2.0, %v563_v49 }
 0x266   : > { %v547_v52 = vpop.f32.mrb[4].mxu1 }
 0x267   : > { %v572_v53 = vsub.f32 %v547_v52, %v561_v47  ;;  %v861_v54 = vpop.f32.mrb[5].mxu1  ;;  %v571_v61 = vadd.f32 0.0001, %v570_v51  ;;  %v565_v3 = vadd.f32 0.0001, %v564_v60 }
 0x26a   : > { %v552_v55 = vpop.f32.mrb[6].mxu1 }
 0x26b   : > { %v573_v56 = vadd.f32 %v572_v53, %v552_v55  ;;  %v864_v57 = vpop.f32.mrb[7].mxu1 }
 0x26d   : > { %v574_v58 = vsub.f32 %v573_v56, %v562_v48 }
 0x26e   : > { %v557_v59 = vpop.f32.mrb[8].mxu1 }
 0x26f   : > { %v575_v62 = vadd.f32 0.0009, %v574_v58  ;;  %v566_v63 = vsub.f32 %v557_v59, %v563_v49  ;;  %v867_v0 = vpop.f32.mrb[9].mxu1 }
 0x271   : > { %v576_v1 = vmul.f32 %v575_v62, %v571_v61  ;;  %v567_v2 = vmul.f32 2.0, %v566_v63 }
 0x273   : > { %978 = vrcp.f32 %v576_v1  ;;  %v568_v4 = vadd.f32 0.0009, %v567_v2 }
 0x275   : > { %v569_v5 = vmul.f32 %v568_v4, %v565_v3 }
 0x27d   : > { %v979_v9 = vpop.eup %978 }
 0x27e   : > { %v578_v10 = vmul.f32 %v979_v9, %v576_v1 }
 0x280   : > { %v579_v11 = vsub.f32 2.0, %v578_v10 }
 0x282   : > { %v580_v12 = vmul.f32 %v979_v9, %v579_v11 }
 0x284   : > { %v582_v13 = vmul.f32 %v580_v12, %v569_v5 }
 0x286   : > { %v593_v14 = vsel %vm591_vm5, %v582_v13, 0.0 }
 0x287   : > { %594 = vadd.xlane.f32.xlu0 %v593_v14 }
 0x314   : > { %v595_v15 = vpop.xlane.xlu0 %594 }
 0x315   : > { %v596_v16 = vrot.slane %v595_v15, 4 }
 0x317   : > { %v597_v17 = vadd.f32 %v596_v16, %v595_v15 }
 0x319   : > { %v598_v18 = vrot.slane %v597_v17, 2 }
 0x31b   : > { %v599_v19 = vadd.f32 %v598_v18, %v597_v17 }
 0x31d   : > { %v600_v20 = vrot.slane %v599_v19, 1 }
 0x31f   : > { %v601_v21 = vadd.f32 %v600_v20, %v599_v19 }
 0x321   : > { %899 = vpush %v601_v21 }
 0x352   : > { %s900_s8 = spop %899 }
 0x353   : > { %v603_v22 = vstv %s900_s8 }
 0x354   : > { %604 = vst [vmem:[%s284_s27] sm:$0xff] %v603_v22 }
 0x355   : > { %1109 = shalt.err (!%p1106_p7)
}
 0x356   : > { %s1110_s7 = scalar_lea.hbm %s1483_s30, 128  ;;  %s1114_s25 = scalar_lea.hbm %s1529_s4, 256 }
 0x357   : > { %p1111_p9 = scmp.ne.s32.totalorder %s1483_s30, %s1110_s7  ;;  %p1115_p11 = scmp.lt.u32.totalorder %s1483_s30, %s1529_s4 }
 0x358   : > { %p1116_p2 = scmp.lt.u32.totalorder %s1114_s25, %s1110_s7  ;;  %p1118_p1 = scmp.lt.u32.totalorder %s1110_s7, %s1483_s30 }
 0x359   : > { %p1112_p0 = pnand %p1111_p9, %p1553_p13 }
 0x35a   : > { %p1117_p12 = por %p1116_p2, %p1115_p11 }
 0x35b   : > { %p1113_p8 = pneg %p1112_p0 }
 0x35c   : > { %p1119_p6 = por %p1118_p1, %p1117_p12 }
 0x35e   : > { %p1120_p10 = pnand %p1119_p6, %p1113_p8 }
 0x360   : > { %1123 = shalt.err (!%p1120_p10)
}
 0x361   : > { %913 = dma.vmem_to_hbm [thread:$0]  (%p1553_p13), %s1478_s10, 128, %s1483_s30, %s606_s6  }
 0x362 PF: > { %s631_s21 = sand.u32 1, %s1162_s15   ;;  %p1554_p4 = scmp.ne.s32.totalorder %s1539_s22, 0 }
 0x363   : > { %p1555_p5 = scmp.ge.s32.totalorder %s1174_s18, 2  ;;  %s632_s27 = scalar_lea.sflag [#allocation5], %s631_s21 }
 0x365   : > { %p930_p3 = pnand %p1555_p5, %p1554_p4 }
 0x367   : > { %1157 = dma.done.wait (!%p930_p3), %s632_s27, 128  }
 0x368   : > { %1159 = vsyncadd (!%p930_p3), %s632_s27, 4294967168  ;;  %p21_p7 = scmp.ge.s32.totalorder %s1327_s26, 4   ;;  %s1556_s15 = smov %s1166_s16 }
 0x369   : > { %s1557_s16 = smov %s1170_s17  ;;  %s1558_s17 = smov %s1343_s14 }
 0x36a   : > { %s1559_s18 = smov %s1327_s26  ;;  %23 = sbr.rel (!%p21_p7) target bundleno = 10 (0xa), region = 102 }
 0x371   :  { %637 = vsyncpa [#allocation4], 1 }
 0x372   :  { %639 = vsyncpa [#allocation4 + $0x1], 1 }
 0x373   :  { %640 = vsyncpa [#allocation7], 1 }
 0x374   :  { %642 = vsyncpa [#allocation7 + $0x1], 1 }
 0x375   :  { %643 = vsyncpa [#allocation10], 1 }
 0x376   :  { %644 = vsyncpa [#allocation5], 1 }
 0x377   :  { %646 = vsyncpa [#allocation5 + $0x1], 1 }

</bundles_post_ra>
